<compile_context>
chip_gen: v7x
topology: tpu7x:2x2x1
jax: 0.10.0
libtpu: 0.0.40
codegen_flags: <defaults>
</compile_context>

<pallas_src>
import functools

import jax
import jax.numpy as jnp
from jax import lax
from jax.experimental import pallas as pl
from jax.experimental.pallas import tpu as pltpu
import numpy as np

O_PAD = 128  # lane-dense padded width of the ordinal head


def _sentiment_kernel(ids_ref, len_ref, ptab_ref, whh_ref, brec_ref,
                      wlin_ref, blin_ref, out_ref):
    """Single-invocation Pallas kernel (no grid; whole problem fits VMEM).

    ids_ref  : (T*B, 1)   i32   token ids, time-major row order (row = t*B + b)
    len_ref  : (B, 1)     i32   sequence lengths
    ptab_ref : (V_pad, H) bf16  pre-projected embedding table  emb @ W_ih^T
    whh_ref  : (H, H)     bf16  W_hh^T
    brec_ref : (1, H)     f32   b_ih + b_hh
    wlin_ref : (H, O_PAD) bf16  W_lin^T zero-padded to 128 lane-dense columns
    blin_ref : (1, O_PAD) f32   b_lin zero-padded
    out_ref  : (B, O_PAD) f32   [logit0 | softplus(logit1..)] (cumsum of the
                                first O columns is done in the wrapper)
    """
    B = len_ref.shape[0]
    TB = ids_ref.shape[0]
    T = TB // B
    H = whh_ref.shape[0]
    V_pad = ptab_ref.shape[0]

    # (1) Fused embedding gather + input projection: one-hot(ids) @ (emb@W_ih^T)
    #     selects rows exactly (0/1 weights, f32 accumulate) -> one bf16 MXU
    #     matmul replaces the XLA gather and the per-call (T*B,E)@(E,H) matmul.
    onehot = jnp.where(
        ids_ref[...] == lax.broadcasted_iota(jnp.int32, (TB, V_pad), 1),
        1.0, 0.0).astype(jnp.bfloat16)                               # (T*B, V_pad)
    x_proj = jnp.dot(onehot, ptab_ref[...],
                     preferred_element_type=jnp.float32) + brec_ref[...]  # (T*B, H) f32

    # (2) Loop-invariant hoists: W_hh load and ALL T length masks (compare +
    #     (B,1)->(B,H) broadcast) built once, off the serial per-step chain.
    whh = whh_ref[...]                                   # (H, H) bf16
    lengths = len_ref[...]                               # (B, 1) i32
    keep = [jnp.broadcast_to(t < lengths, (B, H)) for t in range(T)]

    # (3) Fully-unrolled recurrence (T small & static): per step only one
    #     (B,H)@(H,H) bf16 MXU matmul + add + tanh + select on the chain.
    #     State kept f32 on the elementwise path (valid on v5e, which has no
    #     bf16 VPU/EUP); the bf16 pack at the MXU boundary is a single vreg.
    h = jnp.zeros((B, H), jnp.float32)
    for t in range(T):
        pre = x_proj[t * B:(t + 1) * B] + jnp.dot(
            h.astype(jnp.bfloat16), whh, preferred_element_type=jnp.float32)
        # pack_padded_sequence h_n semantics: freeze h[b] once t >= length[b]
        h = jnp.where(keep[t], jnp.tanh(pre), h)

    # (4) Ordinal head: lane-dense bf16 matmul (single MXU pass, half the DMA
    #     of f32 weights).  Column 0 keeps the raw logit, columns >= 1 get
    #     softplus; padded lanes (>= O) carry softplus(0) and are sliced off
    #     outside.  The old f32 triangular cumsum matmul is removed.
    logits = jnp.dot(h.astype(jnp.bfloat16), wlin_ref[...],
                     preferred_element_type=jnp.float32) + blin_ref[...]  # (B, O_PAD)
    col = lax.broadcasted_iota(jnp.int32, logits.shape, 1)
    softplus = jnp.maximum(logits, 0.0) + jnp.log1p(jnp.exp(-jnp.abs(logits)))
    out_ref[...] = jnp.where(col == 0, logits, softplus)


def prepare_params(params, *, o_pad=O_PAD):
    """One-time parameter prep, run OUTSIDE the per-call path.

    Folds embedding + input projection into a projected lookup table
    P[v] = embedding[v] @ W_ih^T (computed in f32, rounded to bf16 once) and
    produces transposed / cast / lane-padded recurrence and head weights.
    """
    emb = params["embedding"]                       # (V, E) f32
    V = emb.shape[0]
    H = params["w_hh"].shape[0]
    O = params["w_lin"].shape[0]
    v_pad = max(128, ((V + 127) // 128) * 128)      # lane-dense one-hot width
    ptab = jnp.zeros((v_pad, H), jnp.float32).at[:V, :].set(emb @ params["w_ih"].T)
    return dict(
        ptab=ptab.astype(jnp.bfloat16),                                    # (V_pad, H)
        whh_t=params["w_hh"].T.astype(jnp.bfloat16),                       # (H, H)
        brec=(params["b_ih"] + params["b_hh"]).reshape(1, H).astype(jnp.float32),
        wlin_pad=jnp.zeros((H, o_pad), jnp.bfloat16)
                  .at[:, :O].set(params["w_lin"].T.astype(jnp.bfloat16)),  # (H, O_PAD)
        blin_pad=jnp.zeros((1, o_pad), jnp.float32)
                  .at[:, :O].set(params["b_lin"][None, :]),                # (1, O_PAD)
    )


@functools.partial(jax.jit, static_argnames=("output_size",))
def sentiment_net_forward(input_ids, lengths, prepped, *, output_size):
    """input_ids: (B, T) int32, lengths: (B, 1) int32 -> (B, output_size) f32."""
    B, T = input_ids.shape
    if B % 8 != 0:
        raise ValueError("Batch must be a multiple of 8 (TPU sublane tile); pad it.")

    # Only per-call glue left: reorder token ids to time-major rows (tiny i32 op).
    ids_tm = input_ids.T.reshape(T * B, 1).astype(jnp.int32)

    vmem = pl.BlockSpec(memory_space=pltpu.MemorySpace.VMEM)
    out_pad = pl.pallas_call(
        _sentiment_kernel,
        out_shape=jax.ShapeDtypeStruct((B, O_PAD), jnp.float32),
        in_specs=[vmem] * 7,
        out_specs=vmem,
        # Whole problem in VMEM, no grid: ~100 KiB of inputs at these shapes.
    )(ids_tm, lengths.astype(jnp.int32), prepped["ptab"], prepped["whh_t"],
      prepped["brec"], prepped["wlin_pad"], prepped["blin_pad"])

    # Ordinal-head epilogue: drop the lane padding, cumsum the O real columns
    # (4-wide; cheaper than any 128-wide in-kernel scan / triangular matmul).
    return jnp.cumsum(out_pad[:, :output_size], axis=1)


def init_params(key, vocab_size, embed_dim, hidden_size, output_size, pad_idx=1):
    ks = jax.random.split(key, 7)
    emb = jax.random.normal(ks[0], (vocab_size, embed_dim), jnp.float32)
    emb = emb.at[pad_idx].set(0.0)               # padding_idx row is zero
    k = 1.0 / np.sqrt(hidden_size)
    w_ih = jax.random.uniform(ks[1], (hidden_size, embed_dim), jnp.float32, -k, k)
    w_hh = jax.random.uniform(ks[2], (hidden_size, hidden_size), jnp.float32, -k, k)
    b_ih = jax.random.uniform(ks[3], (hidden_size,), jnp.float32, -k, k)
    b_hh = jax.random.uniform(ks[4], (hidden_size,), jnp.float32, -k, k)
    kl = 1.0 / np.sqrt(hidden_size)
    w_lin = jax.random.uniform(ks[5], (output_size, hidden_size), jnp.float32, -kl, kl)
    b_lin = jax.random.uniform(ks[6], (output_size,), jnp.float32, -kl, kl)
    return dict(embedding=emb, w_ih=w_ih, w_hh=w_hh, b_ih=b_ih, b_hh=b_hh,
                w_lin=w_lin, b_lin=b_lin)


def _reference_forward(input_ids, lengths, params):
    """Pure-JAX f32 reference (mirrors the PyTorch forward)."""
    emb = jnp.take(params["embedding"], input_ids, axis=0)     # (B, T, E)
    B, T, _ = emb.shape
    H = params["w_hh"].shape[0]
    h = jnp.zeros((B, H), jnp.float32)
    for t in range(T):
        h_new = jnp.tanh(emb[:, t] @ params["w_ih"].T
                         + h @ params["w_hh"].T
                         + params["b_ih"] + params["b_hh"])
        mask = (t < lengths).astype(jnp.float32)               # (B,1)
        h = mask * h_new + (1.0 - mask) * h
    logits = h @ params["w_lin"].T + params["b_lin"]
    pre = jnp.concatenate([logits[:, :1], jax.nn.softplus(logits[:, 1:])], axis=1)
    return jnp.cumsum(pre, axis=1)


if __name__ == "__main__":
    B, T, E, H, L = 8, 8, 128, 128, 5            # output_size = L - 1 = 4
    VOCAB, PAD_IDX = 64, 1

    key = jax.random.PRNGKey(0)
    kp, ki, kl = jax.random.split(key, 3)
    params = init_params(kp, VOCAB, E, H, L - 1, pad_idx=PAD_IDX)
    prepped = prepare_params(params)             # one-time, outside the hot path

    # descending lengths (pack_padded_sequence enforce_sorted=True semantics)
    lengths = jnp.sort(
        jax.random.randint(kl, (B,), 2, T + 1), descending=True
    ).reshape(B, 1).astype(jnp.int32)

    ids = jax.random.randint(ki, (B, T), 2, VOCAB).astype(jnp.int32)
    pos = jnp.arange(T)[None, :]
    input_ids = jnp.where(pos < lengths, ids, PAD_IDX)          # pad tail with pad_idx

    out = sentiment_net_forward(input_ids, lengths, prepped, output_size=L - 1)
    out = jax.block_until_ready(out)

    ref = _reference_forward(input_ids, lengths, params)
    # bf16 matmul operands (f32 accumulate) -> relaxed tolerance vs f32 reference
    np.testing.assert_allclose(np.asarray(out), np.asarray(ref), rtol=5e-2, atol=5e-2)

    print("KERNEL_OK")
</pallas_src>

<mosaic_0001>
module attributes {stable_mosaic.version = 11 : i64} {
  func.func @_sentiment_kernel(%arg0: memref<64x1xi32, #tpu.memory_space<vmem>>, %arg1: memref<8x1xi32, #tpu.memory_space<vmem>>, %arg2: memref<128x128xbf16, #tpu.memory_space<vmem>>, %arg3: memref<128x128xbf16, #tpu.memory_space<vmem>>, %arg4: memref<1x128xf32, #tpu.memory_space<vmem>>, %arg5: memref<128x128xbf16, #tpu.memory_space<vmem>>, %arg6: memref<1x128xf32, #tpu.memory_space<vmem>>, %arg7: memref<8x128xf32, #tpu.memory_space<vmem>>) attributes {dimension_semantics = [], scalar_prefetch = 0 : i64, scratch_operands = 0 : i64, tpu.core_type = #tpu.core_type<tc>} {
    %c0 = arith.constant 0 : index
    %c0_0 = arith.constant 0 : index
    %0 = vector.load %arg0[%c0, %c0_0] : memref<64x1xi32, #tpu.memory_space<vmem>>, vector<64x1xi32>
    %1 = tpu.iota {dimensions = array<i32: 1>} : vector<64x128xi32>
    %2 = vector.broadcast %0 : vector<64x1xi32> to vector<64x128xi32>
    %3 = arith.cmpi eq, %2, %1 : vector<64x128xi32>
    %cst = arith.constant 1.000000e+00 : f32
    %cst_1 = arith.constant 0.000000e+00 : f32
    %4 = vector.broadcast %cst : f32 to vector<64x128xf32>
    %5 = vector.broadcast %cst_1 : f32 to vector<64x128xf32>
    %6 = arith.select %3, %4, %5 : vector<64x128xi1>, vector<64x128xf32>
    %7 = arith.truncf %6 : vector<64x128xf32> to vector<64x128xbf16>
    %c0_2 = arith.constant 0 : index
    %c0_3 = arith.constant 0 : index
    %8 = vector.load %arg2[%c0_2, %c0_3] : memref<128x128xbf16, #tpu.memory_space<vmem>>, vector<128x128xbf16>
    %cst_4 = arith.constant dense<0.000000e+00> : vector<64x128xf32>
    %9 = tpu.matmul %7, %8, %cst_4 {dimension_numbers = #tpu.dot_dimension_numbers<[1], [0], [0], [1], [0, 0, 1, 1], [], []>} : vector<64x128xbf16>, vector<128x128xbf16>, vector<64x128xf32> -> vector<64x128xf32>
    %c0_5 = arith.constant 0 : index
    %c0_6 = arith.constant 0 : index
    %10 = vector.load %arg4[%c0_5, %c0_6] : memref<1x128xf32, #tpu.memory_space<vmem>>, vector<1x128xf32>
    %11 = vector.broadcast %10 : vector<1x128xf32> to vector<64x128xf32>
    %12 = arith.addf %9, %11 : vector<64x128xf32>
    %c0_7 = arith.constant 0 : index
    %c0_8 = arith.constant 0 : index
    %13 = vector.load %arg3[%c0_7, %c0_8] : memref<128x128xbf16, #tpu.memory_space<vmem>>, vector<128x128xbf16>
    %c0_9 = arith.constant 0 : index
    %c0_10 = arith.constant 0 : index
    %14 = vector.load %arg1[%c0_9, %c0_10] : memref<8x1xi32, #tpu.memory_space<vmem>>, vector<8x1xi32>
    %c0_i32 = arith.constant 0 : i32
    %15 = vector.broadcast %c0_i32 : i32 to vector<8x1xi32>
    %16 = arith.cmpi sgt, %14, %15 : vector<8x1xi32>
    %17 = vector.shape_cast %16 : vector<8x1xi1> to vector<8x1xi1>
    %18 = vector.broadcast %17 : vector<8x1xi1> to vector<8x128xi1>
    %c1_i32 = arith.constant 1 : i32
    %19 = vector.broadcast %c1_i32 : i32 to vector<8x1xi32>
    %20 = arith.cmpi sgt, %14, %19 : vector<8x1xi32>
    %21 = vector.shape_cast %20 : vector<8x1xi1> to vector<8x1xi1>
    %22 = vector.broadcast %21 : vector<8x1xi1> to vector<8x128xi1>
    %c2_i32 = arith.constant 2 : i32
    %23 = vector.broadcast %c2_i32 : i32 to vector<8x1xi32>
    %24 = arith.cmpi sgt, %14, %23 : vector<8x1xi32>
    %25 = vector.shape_cast %24 : vector<8x1xi1> to vector<8x1xi1>
    %26 = vector.broadcast %25 : vector<8x1xi1> to vector<8x128xi1>
    %c3_i32 = arith.constant 3 : i32
    %27 = vector.broadcast %c3_i32 : i32 to vector<8x1xi32>
    %28 = arith.cmpi sgt, %14, %27 : vector<8x1xi32>
    %29 = vector.shape_cast %28 : vector<8x1xi1> to vector<8x1xi1>
    %30 = vector.broadcast %29 : vector<8x1xi1> to vector<8x128xi1>
    %c4_i32 = arith.constant 4 : i32
    %31 = vector.broadcast %c4_i32 : i32 to vector<8x1xi32>
    %32 = arith.cmpi sgt, %14, %31 : vector<8x1xi32>
    %33 = vector.shape_cast %32 : vector<8x1xi1> to vector<8x1xi1>
    %34 = vector.broadcast %33 : vector<8x1xi1> to vector<8x128xi1>
    %c5_i32 = arith.constant 5 : i32
    %35 = vector.broadcast %c5_i32 : i32 to vector<8x1xi32>
    %36 = arith.cmpi sgt, %14, %35 : vector<8x1xi32>
    %37 = vector.shape_cast %36 : vector<8x1xi1> to vector<8x1xi1>
    %38 = vector.broadcast %37 : vector<8x1xi1> to vector<8x128xi1>
    %c6_i32 = arith.constant 6 : i32
    %39 = vector.broadcast %c6_i32 : i32 to vector<8x1xi32>
    %40 = arith.cmpi sgt, %14, %39 : vector<8x1xi32>
    %41 = vector.shape_cast %40 : vector<8x1xi1> to vector<8x1xi1>
    %42 = vector.broadcast %41 : vector<8x1xi1> to vector<8x128xi1>
    %c7_i32 = arith.constant 7 : i32
    %43 = vector.broadcast %c7_i32 : i32 to vector<8x1xi32>
    %44 = arith.cmpi sgt, %14, %43 : vector<8x1xi32>
    %45 = vector.shape_cast %44 : vector<8x1xi1> to vector<8x1xi1>
    %46 = vector.broadcast %45 : vector<8x1xi1> to vector<8x128xi1>
    %cst_11 = arith.constant 0.000000e+00 : f32
    %47 = vector.broadcast %cst_11 : f32 to vector<8x128xf32>
    %48 = vector.extract_strided_slice %12 {offsets = [0, 0], sizes = [8, 128], strides = [1, 1]} : vector<64x128xf32> to vector<8x128xf32>
    %49 = arith.truncf %47 : vector<8x128xf32> to vector<8x128xbf16>
    %cst_12 = arith.constant dense<0.000000e+00> : vector<8x128xf32>
    %50 = tpu.matmul %49, %13, %cst_12 {dimension_numbers = #tpu.dot_dimension_numbers<[1], [0], [0], [1], [0, 0, 1, 1], [], []>} : vector<8x128xbf16>, vector<128x128xbf16>, vector<8x128xf32> -> vector<8x128xf32>
    %51 = arith.addf %48, %50 : vector<8x128xf32>
    %52 = math.tanh %51 : vector<8x128xf32>
    %53 = arith.select %18, %52, %47 : vector<8x128xi1>, vector<8x128xf32>
    %54 = vector.extract_strided_slice %12 {offsets = [8, 0], sizes = [8, 128], strides = [1, 1]} : vector<64x128xf32> to vector<8x128xf32>
    %55 = arith.truncf %53 : vector<8x128xf32> to vector<8x128xbf16>
    %cst_13 = arith.constant dense<0.000000e+00> : vector<8x128xf32>
    %56 = tpu.matmul %55, %13, %cst_13 {dimension_numbers = #tpu.dot_dimension_numbers<[1], [0], [0], [1], [0, 0, 1, 1], [], []>} : vector<8x128xbf16>, vector<128x128xbf16>, vector<8x128xf32> -> vector<8x128xf32>
    %57 = arith.addf %54, %56 : vector<8x128xf32>
    %58 = math.tanh %57 : vector<8x128xf32>
    %59 = arith.select %22, %58, %53 : vector<8x128xi1>, vector<8x128xf32>
    %60 = vector.extract_strided_slice %12 {offsets = [16, 0], sizes = [8, 128], strides = [1, 1]} : vector<64x128xf32> to vector<8x128xf32>
    %61 = arith.truncf %59 : vector<8x128xf32> to vector<8x128xbf16>
    %cst_14 = arith.constant dense<0.000000e+00> : vector<8x128xf32>
    %62 = tpu.matmul %61, %13, %cst_14 {dimension_numbers = #tpu.dot_dimension_numbers<[1], [0], [0], [1], [0, 0, 1, 1], [], []>} : vector<8x128xbf16>, vector<128x128xbf16>, vector<8x128xf32> -> vector<8x128xf32>
    %63 = arith.addf %60, %62 : vector<8x128xf32>
    %64 = math.tanh %63 : vector<8x128xf32>
    %65 = arith.select %26, %64, %59 : vector<8x128xi1>, vector<8x128xf32>
    %66 = vector.extract_strided_slice %12 {offsets = [24, 0], sizes = [8, 128], strides = [1, 1]} : vector<64x128xf32> to vector<8x128xf32>
    %67 = arith.truncf %65 : vector<8x128xf32> to vector<8x128xbf16>
    %cst_15 = arith.constant dense<0.000000e+00> : vector<8x128xf32>
    %68 = tpu.matmul %67, %13, %cst_15 {dimension_numbers = #tpu.dot_dimension_numbers<[1], [0], [0], [1], [0, 0, 1, 1], [], []>} : vector<8x128xbf16>, vector<128x128xbf16>, vector<8x128xf32> -> vector<8x128xf32>
    %69 = arith.addf %66, %68 : vector<8x128xf32>
    %70 = math.tanh %69 : vector<8x128xf32>
    %71 = arith.select %30, %70, %65 : vector<8x128xi1>, vector<8x128xf32>
    %72 = vector.extract_strided_slice %12 {offsets = [32, 0], sizes = [8, 128], strides = [1, 1]} : vector<64x128xf32> to vector<8x128xf32>
    %73 = arith.truncf %71 : vector<8x128xf32> to vector<8x128xbf16>
    %cst_16 = arith.constant dense<0.000000e+00> : vector<8x128xf32>
    %74 = tpu.matmul %73, %13, %cst_16 {dimension_numbers = #tpu.dot_dimension_numbers<[1], [0], [0], [1], [0, 0, 1, 1], [], []>} : vector<8x128xbf16>, vector<128x128xbf16>, vector<8x128xf32> -> vector<8x128xf32>
    %75 = arith.addf %72, %74 : vector<8x128xf32>
    %76 = math.tanh %75 : vector<8x128xf32>
    %77 = arith.select %34, %76, %71 : vector<8x128xi1>, vector<8x128xf32>
    %78 = vector.extract_strided_slice %12 {offsets = [40, 0], sizes = [8, 128], strides = [1, 1]} : vector<64x128xf32> to vector<8x128xf32>
    %79 = arith.truncf %77 : vector<8x128xf32> to vector<8x128xbf16>
    %cst_17 = arith.constant dense<0.000000e+00> : vector<8x128xf32>
    %80 = tpu.matmul %79, %13, %cst_17 {dimension_numbers = #tpu.dot_dimension_numbers<[1], [0], [0], [1], [0, 0, 1, 1], [], []>} : vector<8x128xbf16>, vector<128x128xbf16>, vector<8x128xf32> -> vector<8x128xf32>
    %81 = arith.addf %78, %80 : vector<8x128xf32>
    %82 = math.tanh %81 : vector<8x128xf32>
    %83 = arith.select %38, %82, %77 : vector<8x128xi1>, vector<8x128xf32>
    %84 = vector.extract_strided_slice %12 {offsets = [48, 0], sizes = [8, 128], strides = [1, 1]} : vector<64x128xf32> to vector<8x128xf32>
    %85 = arith.truncf %83 : vector<8x128xf32> to vector<8x128xbf16>
    %cst_18 = arith.constant dense<0.000000e+00> : vector<8x128xf32>
    %86 = tpu.matmul %85, %13, %cst_18 {dimension_numbers = #tpu.dot_dimension_numbers<[1], [0], [0], [1], [0, 0, 1, 1], [], []>} : vector<8x128xbf16>, vector<128x128xbf16>, vector<8x128xf32> -> vector<8x128xf32>
    %87 = arith.addf %84, %86 : vector<8x128xf32>
    %88 = math.tanh %87 : vector<8x128xf32>
    %89 = arith.select %42, %88, %83 : vector<8x128xi1>, vector<8x128xf32>
    %90 = vector.extract_strided_slice %12 {offsets = [56, 0], sizes = [8, 128], strides = [1, 1]} : vector<64x128xf32> to vector<8x128xf32>
    %91 = arith.truncf %89 : vector<8x128xf32> to vector<8x128xbf16>
    %cst_19 = arith.constant dense<0.000000e+00> : vector<8x128xf32>
    %92 = tpu.matmul %91, %13, %cst_19 {dimension_numbers = #tpu.dot_dimension_numbers<[1], [0], [0], [1], [0, 0, 1, 1], [], []>} : vector<8x128xbf16>, vector<128x128xbf16>, vector<8x128xf32> -> vector<8x128xf32>
    %93 = arith.addf %90, %92 : vector<8x128xf32>
    %94 = math.tanh %93 : vector<8x128xf32>
    %95 = arith.select %46, %94, %89 : vector<8x128xi1>, vector<8x128xf32>
    %96 = arith.truncf %95 : vector<8x128xf32> to vector<8x128xbf16>
    %c0_20 = arith.constant 0 : index
    %c0_21 = arith.constant 0 : index
    %97 = vector.load %arg5[%c0_20, %c0_21] : memref<128x128xbf16, #tpu.memory_space<vmem>>, vector<128x128xbf16>
    %cst_22 = arith.constant dense<0.000000e+00> : vector<8x128xf32>
    %98 = tpu.matmul %96, %97, %cst_22 {dimension_numbers = #tpu.dot_dimension_numbers<[1], [0], [0], [1], [0, 0, 1, 1], [], []>} : vector<8x128xbf16>, vector<128x128xbf16>, vector<8x128xf32> -> vector<8x128xf32>
    %c0_23 = arith.constant 0 : index
    %c0_24 = arith.constant 0 : index
    %99 = vector.load %arg6[%c0_23, %c0_24] : memref<1x128xf32, #tpu.memory_space<vmem>>, vector<1x128xf32>
    %100 = vector.broadcast %99 : vector<1x128xf32> to vector<8x128xf32>
    %101 = arith.addf %98, %100 : vector<8x128xf32>
    %102 = tpu.iota {dimensions = array<i32: 1>} : vector<8x128xi32>
    %cst_25 = arith.constant 0.000000e+00 : f32
    %103 = vector.broadcast %cst_25 : f32 to vector<8x128xf32>
    %104 = arith.maximumf %101, %103 : vector<8x128xf32>
    %105 = math.absf %101 : vector<8x128xf32>
    %cst_26 = arith.constant 0.000000e+00 : f32
    %106 = vector.broadcast %cst_26 : f32 to vector<8x128xf32>
    %107 = arith.subf %106, %105 : vector<8x128xf32>
    %108 = math.exp %107 : vector<8x128xf32>
    %109 = math.log1p %108 : vector<8x128xf32>
    %110 = arith.addf %104, %109 : vector<8x128xf32>
    %c0_i32_27 = arith.constant 0 : i32
    %111 = vector.broadcast %c0_i32_27 : i32 to vector<8x128xi32>
    %112 = arith.cmpi eq, %102, %111 : vector<8x128xi32>
    %113 = arith.select %112, %101, %110 : vector<8x128xi1>, vector<8x128xf32>
    %c0_28 = arith.constant 0 : index
    %c0_29 = arith.constant 0 : index
    %114 = vector.load %arg7[%c0_28, %c0_29] : memref<8x128xf32, #tpu.memory_space<vmem>>, vector<8x128xf32>
    tpu.vector_store %arg7[%c0_28, %c0_29], %113 {strides = array<i32>} : memref<8x128xf32, #tpu.memory_space<vmem>>, vector<8x128xf32>,
    return
  }
}

</mosaic_0001>

<bundles_post_ra>
// kernel: sentiment_net_forward.1
= control target key start
LH: loop header
LB: loop body
LE: loop exit
PB: predicated region body
PF: predicated region fallthrough
CT: control target
= control target key end

     0   :  { %12 = vsyncpa [#allocation3], 0  ;;  %s1626_s0 = inlined_call_operand.vmem [shape: s32[64,1], index: 0, kind: input, shape index: {}]   ;;  %s1627_s1 = inlined_call_operand.vmem [shape: s32[8,1], index: 1, kind: input, shape index: {}]   ;;  %s1628_s2 = inlined_call_operand.vmem [shape: bf16[128,128], index: 2, kind: input, shape index: {}]   ;;  %s1629_s3 = inlined_call_operand.hbm [shape: bf16[128,128], index: 3, kind: input, shape index: {}]   ;;  %s1630_s4 = inlined_call_operand.vmem [shape: f32[1,128], index: 4, kind: input, shape index: {}]   ;;  %s1631_s5 = inlined_call_operand.hbm [shape: bf16[128,128], index: 5, kind: input, shape index: {}]   ;;  %s1632_s6 = inlined_call_operand.vmem [shape: f32[1,128], index: 6, kind: input, shape index: {}]   ;;  %s1633_s7 = inlined_call_operand.vmem [shape: f32[8,128], index: 7, kind: output, shape index: {}]  }
   0x1   :  { %13 = vsyncpa [#allocation5], 0  ;;  %s1281_s24 = smov [#allocation2]   ;;  %s1233_s28 = scalar_lea.hbm %s1629_s3, 1024 }
   0x2   :  { %s25_s25 = sshll.u32 %s1281_s24, 4  ;;  %p1234_p0 = scmp.ne.s32.totalorder %s1629_s3, %s1233_s28  ;;  %s26_s25 = int_to_ptr.vmem [resolvable:$true] %s25_s25 }
   0x3   :  { %p1237_p1 = scmp.lt.u32.totalorder %s1233_s28, %s1629_s3 }
   0x5   :  { %p1239_p2 = pnand %p1237_p1, %p1234_p0 }
   0x7   :  { %1242 = shalt.err (!%p1239_p2)
}
   0x8   :  { %s1243_s10 = scalar_lea.vmem %s26_s25, 1024  ;;  %p1248_p4 = scmp.lt.s32.totalorder %s26_s25, %s26_s25 }
   0x9   :  { %p1244_p3 = scmp.ne.s32.totalorder %s26_s25, %s1243_s10  ;;  %p1249_p5 = scmp.lt.s32.totalorder %s1243_s10, %s1243_s10 }
   0xb   :  { %p1250_p6 = por %p1249_p5, %p1248_p4 }
   0xd   :  { %p1251_p7 = pnand %p1250_p6, %p1244_p3 }
   0xf   :  { %1254 = shalt.err (!%p1251_p7)
}
  0x10   :  { %s1282_s11 = smov 64   ;;  %s1283_s12 = smov 4  }
  0x11   :  { %31 = dma.hbm_to_vmem [thread:$0]  %s1629_s3, 1024, %s26_s25, [#allocation3], %s1282_s11, %s1282_s11, %s1283_s12  }
  0x12   :  { %s1284_s15 = smov [#allocation4]   ;;  %s1255_s19 = scalar_lea.hbm %s1631_s5, 1024 }
  0x13   :  { %s39_s16 = sshll.u32 %s1284_s15, 4  ;;  %p1256_p8 = scmp.ne.s32.totalorder %s1631_s5, %s1255_s19  ;;  %s40_s16 = int_to_ptr.vmem [resolvable:$true] %s39_s16 }
  0x14   :  { %p1259_p9 = scmp.lt.u32.totalorder %s1255_s19, %s1631_s5 }
  0x16   :  { %p1261_p10 = pnand %p1259_p9, %p1256_p8 }
  0x18   :  { %1264 = shalt.err (!%p1261_p10)
}
  0x19   :  { %s1265_s24 = scalar_lea.vmem %s40_s16, 1024  ;;  %p1270_p12 = scmp.lt.s32.totalorder %s40_s16, %s40_s16 }
  0x1a   :  { %p1266_p11 = scmp.ne.s32.totalorder %s40_s16, %s1265_s24  ;;  %p1271_p13 = scmp.lt.s32.totalorder %s1265_s24, %s1265_s24 }
  0x1c   :  { %p1272_p0 = por %p1271_p13, %p1270_p12 }
  0x1e   :  { %p1273_p1 = pnand %p1272_p0, %p1266_p11 }
  0x20   :  { %1276 = shalt.err (!%p1273_p1)
}
  0x21   :  { %45 = dma.hbm_to_vmem [thread:$0]  %s1631_s5, 1024, %s40_s16, [#allocation5], %s1282_s11, %s1282_s11, %s1283_s12  }
  0x22   :  { %1277 = dma.done.wait [#allocation3], 1024  }
  0x23   :  { %1278 = vsyncadd [#allocation3], 4294966272 }
  0x24   :  { %1279 = dma.done.wait [#allocation5], 1024  }
  0x25   :  { %1280 = vsyncadd [#allocation5], 4294966272  ;;  %v1285_v0 = vmov 0   ;;  %v1286_v1 = vmov 0.0   ;;  %v57_v2 = vld [vmem:[%s1626_s0 + $0x10] sm:$0xff]  ;;  %v55_v3 = vld [vmem:[%s1626_s0] sm:$0xff]  ;;  %v63_v35 = vlaneseq }
  0x26   :  { %1188 = vset.pattern.permute.xlu1 %v1285_v0  ;;  %1187 = vset.pattern.permute.xlu0 %v1285_v0  ;;  %v58_v4 = vld [vmem:[%s1626_s0 + $0x18] sm:$0xff]  ;;  %v56_v5 = vld [vmem:[%s1626_s0 + $0x8] sm:$0xff]  ;;  %v1189_v7 = vld [vmem:[%s1628_s2] sm:$0xff]   ;;  %vm1287_vm1 = vmmov 0   ;;  %v1288_v41 = vmov 1.0|1.0  }
  0x27   :  { %999 = vmatprep.subr.bf16.mxu1 %v1286_v1  ;;  %72 = vperm.xlu1 %1188, %v57_v2   ;;  %v60_v6 = vld [vmem:[%s1626_s0 + $0x28] sm:$0xff]  ;;  %v1374_v8 = vld [vmem:[#allocation2] sm:$0xff]   ;;  %v62_v11 = vld [vmem:[%s1626_s0 + $0x38] sm:$0xff]  ;;  %v1469_v38 = vand.u32 127, %v63_v35 }
  0x28   :  { %66 = vperm.xlu0 %1187, %v55_v3   ;;  %v59_v9 = vld [vmem:[%s1626_s0 + $0x20] sm:$0xff]  ;;  %975 = vmatprep.subr.bf16.mxu0 %v1189_v7  ;;  %v61_v12 = vld [vmem:[%s1626_s0 + $0x30] sm:$0xff]  ;;  %v1191_v13 = vld [vmem:[%s1628_s2 + $0x8] sm:$0xff]  }
  0x29   :  { %v261_v10 = vld [vmem:[%s1627_s1] sm:$0xff]  ;;  %1000 = vmatpush3.bf16.msra.mxu1 %v1374_v8  ;;  %976 = vmatpush3.bf16.msra.mxu0 %v1189_v7  ;;  %v1393_v14 = vld [vmem:[#allocation2 + $0x8] sm:$0xff]   ;;  %v1193_v15 = vld [vmem:[%s1628_s2 + $0x10] sm:$0xff]  }
  0x2a   :  { %1001 = vmatprep.subr.bf16.mxu1 %v1286_v1  ;;  %vm268_vm0 = vcmp.gt.s32.totalorder %v261_v10, 1  ;;  %977 = vmatprep.subr.bf16.mxu0 %v1191_v13  ;;  %vm262_vm2 = vcmp.gt.s32.totalorder %v261_v10, 0  ;;  %v1401_v16 = vld [vmem:[#allocation2 + $0x10] sm:$0xff]   ;;  %vm280_vm3 = vcmp.gt.s32.totalorder %v261_v10, 3  ;;  %vm274_vm4 = vcmp.gt.s32.totalorder %v261_v10, 2  ;;  %v1195_v19 = vld [vmem:[%s1628_s2 + $0x18] sm:$0xff]  }
  0x2b   :  { %75 = vperm.xlu1 %1188, %v58_v4   ;;  %1015 = vmatprep.mubr.msk.bf16.mxu1 %vm1287_vm1, %v1286_v1  ;;  %v269_v17 = vsel %vm268_vm0, 1, %v1285_v0  ;;  %v263_v18 = vsel %vm262_vm2, 1, %v1285_v0  ;;  %v281_v20 = vsel %vm280_vm3, 1, %v1285_v0  ;;  %v1411_v21 = vld [vmem:[#allocation2 + $0x18] sm:$0xff]   ;;  %v275_v22 = vsel %vm274_vm4, 1, %v1285_v0  ;;  %v1197_v23 = vld [vmem:[%s1628_s2 + $0x20] sm:$0xff]  }
  0x2c   :  { %69 = vperm.xlu0 %1187, %v56_v5   ;;  %vm292_vm5 = vcmp.gt.s32.totalorder %v261_v10, 5  ;;  %vm286_vm6 = vcmp.gt.s32.totalorder %v261_v10, 4  ;;  %vm304_vm7 = vcmp.gt.s32.totalorder %v261_v10, 7  ;;  %vm298_vm8 = vcmp.gt.s32.totalorder %v261_v10, 6  ;;  %v1419_v24 = vld [vmem:[#allocation2 + $0x20] sm:$0xff]   ;;  %v1199_v29 = vld [vmem:[%s1628_s2 + $0x28] sm:$0xff]  }
  0x2d   :  { %1002 = vmatpush3.bf16.msra.mxu1 %v1393_v14  ;;  %978 = vmatpush3.bf16.msra.mxu0 %v1191_v13  ;;  %v293_v25 = vsel %vm292_vm5, 1, %v1285_v0  ;;  %v287_v26 = vsel %vm286_vm6, 1, %v1285_v0  ;;  %v305_v27 = vsel %vm304_vm7, 1, %v1285_v0  ;;  %v299_v28 = vsel %vm298_vm8, 1, %v1285_v0  ;;  %v1429_v30 = vld [vmem:[#allocation2 + $0x28] sm:$0xff]   ;;  %v1201_v31 = vld [vmem:[%s1628_s2 + $0x30] sm:$0xff]  }
  0x2e   :  { %1003 = vmatprep.subr.bf16.mxu1 %v1286_v1  ;;  %979 = vmatprep.subr.bf16.mxu0 %v1193_v15  ;;  %v1437_v32 = vld [vmem:[#allocation2 + $0x30] sm:$0xff]   ;;  %v1203_v33 = vld [vmem:[%s1628_s2 + $0x38] sm:$0xff]   ;;  %v845_v50 = vld [vmem:[%s1630_s4] ss:$0 sm:$0xff] }
  0x2f   :  { %81 = vperm.xlu1 %1188, %v60_v6   ;;  %v1444_v34 = vld [vmem:[#allocation2 + $0x38] sm:$0xff]  }
  0x30   :  { %78 = vperm.xlu0 %1187, %v59_v9  }
  0x31   :  { %1004 = vmatpush3.bf16.msra.mxu1 %v1401_v16  ;;  %980 = vmatpush3.bf16.msra.mxu0 %v1193_v15 }
  0x32   :  { %1005 = vmatprep.subr.bf16.mxu1 %v1286_v1  ;;  %981 = vmatprep.subr.bf16.mxu0 %v1195_v19 }
  0x33   :  { %87 = vperm.xlu1 %1188, %v62_v11  }
  0x34   :  { %84 = vperm.xlu0 %1187, %v61_v12  }
  0x35   :  { %1006 = vmatpush3.bf16.msra.mxu1 %v1411_v21  ;;  %982 = vmatpush3.bf16.msra.mxu0 %v1195_v19 }
  0x36   :  { %1007 = vmatprep.subr.bf16.mxu1 %v1286_v1  ;;  %983 = vmatprep.subr.bf16.mxu0 %v1197_v23 }
  0x37   :  { %271 = vperm.xlu1 %1188, %v269_v17  }
  0x38   :  { %265 = vperm.xlu0 %1187, %v263_v18  }
  0x39   :  { %1008 = vmatpush3.bf16.msra.mxu1 %v1419_v24  ;;  %984 = vmatpush3.bf16.msra.mxu0 %v1197_v23 }
  0x3a   :  { %1009 = vmatprep.subr.bf16.mxu1 %v1286_v1  ;;  %985 = vmatprep.subr.bf16.mxu0 %v1199_v29 }
  0x3b   :  { %283 = vperm.xlu1 %1188, %v281_v20  }
  0x3c   :  { %277 = vperm.xlu0 %1187, %v275_v22  }
  0x3d   :  { %1010 = vmatpush3.bf16.msra.mxu1 %v1429_v30  ;;  %986 = vmatpush3.bf16.msra.mxu0 %v1199_v29 }
  0x3e   :  { %1011 = vmatprep.subr.bf16.mxu1 %v1286_v1  ;;  %987 = vmatprep.subr.bf16.mxu0 %v1201_v31 }
  0x3f   :  { %295 = vperm.xlu1 %1188, %v293_v25  }
  0x40   :  { %289 = vperm.xlu0 %1187, %v287_v26  }
  0x41   :  { %1012 = vmatpush3.bf16.msra.mxu1 %v1437_v32  ;;  %988 = vmatpush3.bf16.msra.mxu0 %v1201_v31 }
  0x42   :  { %1013 = vmatprep.subr.bf16.mxu1 %v1286_v1  ;;  %989 = vmatprep.subr.bf16.mxu0 %v1203_v33 }
  0x43   :  { %307 = vperm.xlu1 %1188, %v305_v27  }
  0x44   :  { %301 = vperm.xlu0 %1187, %v299_v28  }
  0x45   :  { %1014 = vmatpush3.bf16.msra.mxu1 %v1444_v34  ;;  %990 = vmatpush3.bf16.msra.mxu0 %v1203_v33 }
  0x46   :  { %1039 = vmatprep.subr.bf16.mxu1 %v1286_v1  ;;  %1019 = vmatprep.subr.bf16.mxu0 %v1286_v1 }
  0x48   :  { %1016 = vmatmul.mubr.bf16.vlgmr.msra.gmra.mrb[0].mxu1 %v1285_v0 }
  0x49   :  { %1040 = vmatpush3.bf16.msra.mxu1 %v1374_v8  ;;  %1055 = vmatprep.mubr.msk.bf16.mxu1 %vm1287_vm1, %v1286_v1 }
  0x4a   :  { %1041 = vmatprep.subr.bf16.mxu1 %v1286_v1 }
  0x4d   :  { %1042 = vmatpush3.bf16.msra.mxu1 %v1393_v14 }
  0x4e   :  { %1043 = vmatprep.subr.bf16.mxu1 %v1286_v1 }
  0x51   :  { %1044 = vmatpush3.bf16.msra.mxu1 %v1401_v16 }
  0x52   :  { %1045 = vmatprep.subr.bf16.mxu1 %v1286_v1 }
  0x55   :  { %1046 = vmatpush3.bf16.msra.mxu1 %v1411_v21 }
  0x56   :  { %1047 = vmatprep.subr.bf16.mxu1 %v1286_v1 }
  0x59   :  { %1048 = vmatpush3.bf16.msra.mxu1 %v1419_v24 }
  0x5a   :  { %1049 = vmatprep.subr.bf16.mxu1 %v1286_v1 }
  0x5d   :  { %1050 = vmatpush3.bf16.msra.mxu1 %v1429_v30 }
  0x5e   :  { %1051 = vmatprep.subr.bf16.mxu1 %v1286_v1 }
  0x61   :  { %1052 = vmatpush3.bf16.msra.mxu1 %v1437_v32 }
  0x62   :  { %1053 = vmatprep.subr.bf16.mxu1 %v1286_v1 }
  0x65   :  { %1054 = vmatpush3.bf16.msra.mxu1 %v1444_v34 }
  0x66   :  { %1079 = vmatprep.subr.bf16.mxu1 %v1286_v1 }
  0xa6   :  { %v73_v36 = vpop.permute.xlu1 %72 }
  0xa7   :  { %v67_v37 = vpop.permute.xlu0 %66  ;;  %vm91_vm9 = vcmp.eq.s32.totalorder %v73_v36, %v1469_v38 }
  0xa8   :  { %vm89_vm12 = vcmp.eq.s32.totalorder %v67_v37, %v1469_v38 }
  0xaa   :  { %v76_v39 = vpop.permute.xlu1 %75 }
  0xab   :  { %v70_v40 = vpop.permute.xlu0 %69  ;;  %vm92_vm10 = vcmp.eq.s32.totalorder %v76_v39, %v1469_v38 }
  0xac   :  { %vm90_vm11 = vcmp.eq.s32.totalorder %v70_v40, %v1469_v38  ;;  %vm856_vm13 = vmpackc.low %vm92_vm10, %vm91_vm9 }
  0xad   :  { %vm854_vm14 = vmpackc.low %vm90_vm11, %vm89_vm12 }
  0xae   :  { %991 = vmatprep.mubr.msk.bf16.mxu0 %vm854_vm14, %v1288_v41  ;;  %v82_v42 = vpop.permute.xlu1 %81 }
  0xaf   :  { %v79_v43 = vpop.permute.xlu0 %78  ;;  %vm94_vm15 = vcmp.eq.s32.totalorder %v82_v42, %v1469_v38  ;;  %992 = vmatmul.mubr.msk.bf16.vlgmr.msra.gmra.mrb[0].mxu0 %vm856_vm13, %v1288_v41 }
  0xb0   :  { %vm93_vm0 = vcmp.eq.s32.totalorder %v79_v43, %v1469_v38  ;;  %1020 = vmatpush3.bf16.msra.mxu0 %v1374_v8 }
  0xb1   :  { %vm858_vm2 = vmpackc.low %vm94_vm15, %vm93_vm0  ;;  %1021 = vmatprep.subr.bf16.mxu0 %v1286_v1  ;;  %vm836_vm15 = vcmp.eq.s32.totalorder %v1469_v38, 0 }
  0xb2   :  { %995 = vmatprep.mubr.msk.bf16.mxu0 %vm858_vm2, %v1288_v41  ;;  %v88_v44 = vpop.permute.xlu1 %87 }
  0xb3   :  { %v85_v45 = vpop.permute.xlu0 %84  ;;  %vm96_vm3 = vcmp.eq.s32.totalorder %v88_v44, %v1469_v38 }
  0xb4   :  { %vm95_vm4 = vcmp.eq.s32.totalorder %v85_v45, %v1469_v38  ;;  %1022 = vmatpush3.bf16.msra.mxu0 %v1393_v14 }
  0xb5   :  { %vm860_vm5 = vmpackc.low %vm96_vm3, %vm95_vm4  ;;  %1023 = vmatprep.subr.bf16.mxu0 %v1286_v1 }
  0xb6   :  { %v272_v15 = vpop.permute.xlu1 %271 }
  0xb7   :  { %996 = vmatmul.mubr.msk.bf16.gmra.mrb[4].mxu0 %vm860_vm5, %v1288_v41  ;;  %v266_v4 = vpop.permute.xlu0 %265  ;;  %vm273_vm8 = vcmp.eq.s32.totalorder %v272_v15, 1 }
  0xb8   :  { %1024 = vmatpush3.bf16.msra.mxu0 %v1401_v16  ;;  %1035 = vmatprep.mubr.msk.bf16.mxu0 %vm1287_vm1, %v1286_v1  ;;  %vm267_vm6 = vcmp.eq.s32.totalorder %v266_v4, 1 }
  0xb9   :  { %1025 = vmatprep.subr.bf16.mxu0 %v1286_v1  ;;  %vm870_vm7 = vmpackc.low %vm267_vm6, %vm267_vm6 }
  0xba   :  { %v284_v41 = vpop.permute.xlu1 %283 }
  0xbb   :  { %v278_v28 = vpop.permute.xlu0 %277  ;;  %vm285_vm10 = vcmp.eq.s32.totalorder %v284_v41, 1 }
  0xbc   :  { %1026 = vmatpush3.bf16.msra.mxu0 %v1411_v21  ;;  %vm279_vm9 = vcmp.eq.s32.totalorder %v278_v28, 1 }
  0xbd   :  { %1027 = vmatprep.subr.bf16.mxu0 %v1286_v1 }
  0xc0   :  { %1028 = vmatpush3.bf16.msra.mxu0 %v1419_v24 }
  0xc1   :  { %1029 = vmatprep.subr.bf16.mxu0 %v1286_v1 }
  0xc4   :  { %1030 = vmatpush3.bf16.msra.mxu0 %v1429_v30 }
  0xc5   :  { %1031 = vmatprep.subr.bf16.mxu0 %v1286_v1 }
  0xc8   :  { %1032 = vmatpush3.bf16.msra.mxu0 %v1437_v32 }
  0xc9   :  { %1033 = vmatprep.subr.bf16.mxu0 %v1286_v1 }
  0xcc   :  { %1034 = vmatpush3.bf16.msra.mxu0 %v1444_v34 }
  0xcd   :  { %1059 = vmatprep.subr.bf16.mxu0 %v1286_v1 }
 0x11b   :  { %v392_v46 = vpop.f32.mrb[0].mxu1 }
 0x11c   :  { %v1017_v47 = vpop.f32.mrb[1].mxu1 }
 0x11d   :  { %v395_v48 = vpop.f32.mrb[2].mxu1 }
 0x11e   :  { %v1018_v49 = vpop.f32.mrb[3].mxu1 }
 0x182   :  { %v993_v51 = vpop.f32.mrb[0].mxu0 }
 0x183   :  { %v1500_v52 = vadd.f32 %v993_v51, %v845_v50  ;;  %v214_v53 = vpop.f32.mrb[1].mxu0 }
 0x184   :  { %v215_v54 = vadd.f32 %v845_v50, %v214_v53  ;;  %v994_v55 = vpop.f32.mrb[2].mxu0 }
 0x185   :  { %v1502_v56 = vadd.f32 %v994_v55, %v845_v50  ;;  %v217_v57 = vpop.f32.mrb[3].mxu0 }
 0x186   :  { %v398_v58 = vadd.f32 %v392_v46, %v215_v54  ;;  %v218_v59 = vadd.f32 %v845_v50, %v217_v57  ;;  %v1206_v57 = vld [vmem:[#allocation4 + $0x8] sm:$0xff]  }
 0x188   :  { %1213 = vtanh.f32 %v398_v58  ;;  %v1208_v58 = vld [vmem:[#allocation4 + $0x18] sm:$0xff]  }
 0x18a   :  { %v997_v60 = vpop.f32.mrb[4].mxu0 }
 0x18b   :  { %v1504_v61 = vadd.f32 %v997_v60, %v845_v50  ;;  %v230_v62 = vpop.f32.mrb[5].mxu0 }
 0x18c   :  { %v1506_v63 = vadd.f32 %v845_v50, %v230_v62  ;;  %v998_v0 = vpop.f32.mrb[6].mxu0 }
 0x18d   :  { %v1508_v2 = vadd.f32 %v998_v0, %v845_v50  ;;  %v233_v3 = vpop.f32.mrb[7].mxu0 }
 0x18e   :  { %v1510_v5 = vadd.f32 %v845_v50, %v233_v3  ;;  %v290_v50 = vpop.permute.xlu0 %289 }
 0x18f   :  { %vm291_vm11 = vcmp.eq.s32.totalorder %v290_v50, 1 }
 0x192   :  { %v1214_v6 = vpop.eup %1213  ;;  %v302_v3 = vpop.permute.xlu0 %301 }
 0x193   :  { %v871_v7 = vpack.c.bf16 %v1214_v6, %v1214_v6  ;;  %v400_v18 = vsel %vm267_vm6, %v1214_v6, 0.0 }
 0x195   :  { %1036 = vmatmul.mubr.msk.bf16.vlgmr.msra.gmra.mrb[8].mxu0 %vm870_vm7, %v871_v7  ;;  %v1209_v7 = vld [vmem:[#allocation4 + $0x20] sm:$0xff]  }
 0x196   :  { %1060 = vmatpush3.bf16.msra.mxu0 %v1374_v8  ;;  %1075 = vmatprep.mubr.msk.bf16.mxu0 %vm1287_vm1, %v1286_v1 }
 0x197   :  { %1061 = vmatprep.subr.bf16.mxu0 %v1286_v1 }
 0x19a   :  { %1062 = vmatpush3.bf16.msra.mxu0 %v1393_v14 }
 0x19b   :  { %1063 = vmatprep.subr.bf16.mxu0 %v1286_v1 }
 0x19e   :  { %1064 = vmatpush3.bf16.msra.mxu0 %v1401_v16 }
 0x19f   :  { %1065 = vmatprep.subr.bf16.mxu0 %v1286_v1 }
 0x1a2   :  { %1066 = vmatpush3.bf16.msra.mxu0 %v1411_v21 }
 0x1a3   :  { %1067 = vmatprep.subr.bf16.mxu0 %v1286_v1 }
 0x1a6   :  { %1068 = vmatpush3.bf16.msra.mxu0 %v1419_v24 }
 0x1a7   :  { %1069 = vmatprep.subr.bf16.mxu0 %v1286_v1 }
 0x1aa   :  { %1070 = vmatpush3.bf16.msra.mxu0 %v1429_v30 }
 0x1ab   :  { %1071 = vmatprep.subr.bf16.mxu0 %v1286_v1 }
 0x1ae   :  { %1072 = vmatpush3.bf16.msra.mxu0 %v1437_v32 }
 0x1af   :  { %1073 = vmatprep.subr.bf16.mxu0 %v1286_v1 }
 0x1b2   :  { %1074 = vmatpush3.bf16.msra.mxu0 %v1444_v34 }
 0x1b3   :  { %1099 = vmatprep.subr.bf16.mxu0 %v1286_v1 }
 0x268   :  { %v436_v9 = vpop.f32.mrb[8].mxu0 }
 0x269   :  { %v442_v10 = vadd.f32 %v436_v9, %v218_v59  ;;  %v1037_v11 = vpop.f32.mrb[9].mxu0  ;;  %v1210_v9 = vld [vmem:[#allocation4 + $0x28] sm:$0xff]  }
 0x26a   :  { %v439_v12 = vpop.f32.mrb[10].mxu0 }
 0x26b   :  { %1215 = vtanh.f32 %v442_v10  ;;  %v1038_v13 = vpop.f32.mrb[11].mxu0  ;;  %v1211_v10 = vld [vmem:[#allocation4 + $0x30] sm:$0xff]  }
 0x275   :  { %v1216_v17 = vpop.eup %1215 }
 0x276   :  { %v444_v19 = vsel %vm273_vm8, %v1216_v17, %v400_v18 }
 0x277   :  { %v445_v20 = vpack.c.bf16 %v444_v19, %v444_v19 }
 0x279   :  { %1056 = vmatmul.mubr.bf16.vlgmr.msra.gmra.mrb[4].mxu1 %v445_v20 }
 0x27a   :  { %1080 = vmatpush3.bf16.msra.mxu1 %v1374_v8  ;;  %1095 = vmatprep.mubr.msk.bf16.mxu1 %vm1287_vm1, %v1286_v1 }
 0x27b   :  { %1081 = vmatprep.subr.bf16.mxu1 %v1286_v1 }
 0x27e   :  { %1082 = vmatpush3.bf16.msra.mxu1 %v1393_v14 }
 0x27f   :  { %1083 = vmatprep.subr.bf16.mxu1 %v1286_v1 }
 0x282   :  { %1084 = vmatpush3.bf16.msra.mxu1 %v1401_v16 }
 0x283   :  { %1085 = vmatprep.subr.bf16.mxu1 %v1286_v1 }
 0x286   :  { %1086 = vmatpush3.bf16.msra.mxu1 %v1411_v21 }
 0x287   :  { %1087 = vmatprep.subr.bf16.mxu1 %v1286_v1 }
 0x28a   :  { %1088 = vmatpush3.bf16.msra.mxu1 %v1419_v24 }
 0x28b   :  { %1089 = vmatprep.subr.bf16.mxu1 %v1286_v1 }
 0x28e   :  { %1090 = vmatpush3.bf16.msra.mxu1 %v1429_v30 }
 0x28f   :  { %1091 = vmatprep.subr.bf16.mxu1 %v1286_v1 }
 0x292   :  { %1092 = vmatpush3.bf16.msra.mxu1 %v1437_v32 }
 0x293   :  { %1093 = vmatprep.subr.bf16.mxu1 %v1286_v1 }
 0x296   :  { %1094 = vmatpush3.bf16.msra.mxu1 %v1444_v34 }
 0x297   :  { %1119 = vmatprep.subr.bf16.mxu1 %v1286_v1 }
 0x34c   :  { %v480_v22 = vpop.f32.mrb[4].mxu1 }
 0x34d   :  { %v486_v23 = vadd.f32 %v480_v22, %v1500_v52  ;;  %v1057_v25 = vpop.f32.mrb[5].mxu1 }
 0x34e   :  { %v483_v26 = vpop.f32.mrb[6].mxu1 }
 0x34f   :  { %1217 = vtanh.f32 %v486_v23  ;;  %v1058_v27 = vpop.f32.mrb[7].mxu1  ;;  %v873_v23 = vld [vmem:[%s1632_s6] ss:$0 sm:$0xff] }
 0x359   :  { %v1218_v29 = vpop.eup %1217 }
 0x35a   :  { %v488_v31 = vsel %vm279_vm9, %v1218_v29, %v444_v19 }
 0x35b   :  { %v489_v33 = vpack.c.bf16 %v488_v31, %v488_v31 }
 0x35d   :  { %1076 = vmatmul.mubr.bf16.vlgmr.msra.gmra.mrb[12].mxu0 %v489_v33 }
 0x35e   :  { %1100 = vmatpush3.bf16.msra.mxu0 %v1374_v8  ;;  %1115 = vmatprep.mubr.msk.bf16.mxu0 %vm1287_vm1, %v1286_v1 }
 0x35f   :  { %1101 = vmatprep.subr.bf16.mxu0 %v1286_v1 }
 0x362   :  { %1102 = vmatpush3.bf16.msra.mxu0 %v1393_v14 }
 0x363   :  { %1103 = vmatprep.subr.bf16.mxu0 %v1286_v1 }
 0x366   :  { %1104 = vmatpush3.bf16.msra.mxu0 %v1401_v16 }
 0x367   :  { %1105 = vmatprep.subr.bf16.mxu0 %v1286_v1 }
 0x36a   :  { %1106 = vmatpush3.bf16.msra.mxu0 %v1411_v21 }
 0x36b   :  { %1107 = vmatprep.subr.bf16.mxu0 %v1286_v1 }
 0x36e   :  { %1108 = vmatpush3.bf16.msra.mxu0 %v1419_v24 }
 0x36f   :  { %1109 = vmatprep.subr.bf16.mxu0 %v1286_v1 }
 0x372   :  { %1110 = vmatpush3.bf16.msra.mxu0 %v1429_v30 }
 0x373   :  { %1111 = vmatprep.subr.bf16.mxu0 %v1286_v1 }
 0x376   :  { %1112 = vmatpush3.bf16.msra.mxu0 %v1437_v32 }
 0x377   :  { %1113 = vmatprep.subr.bf16.mxu0 %v1286_v1 }
 0x37a   :  { %1114 = vmatpush3.bf16.msra.mxu0 %v1444_v34 }
 0x37b   :  { %1139 = vmatprep.subr.bf16.mxu0 %v1286_v1 }
 0x430   :  { %v524_v35 = vpop.f32.mrb[12].mxu0 }
 0x431   :  { %v530_v36 = vadd.f32 %v524_v35, %v1502_v56  ;;  %v1077_v37 = vpop.f32.mrb[13].mxu0 }
 0x432   :  { %v527_v39 = vpop.f32.mrb[14].mxu0 }
 0x433   :  { %1219 = vtanh.f32 %v530_v36  ;;  %v1078_v40 = vpop.f32.mrb[15].mxu0 }
 0x43d   :  { %v1220_v42 = vpop.eup %1219 }
 0x43e   :  { %v532_v43 = vsel %vm285_vm10, %v1220_v42, %v488_v31 }
 0x43f   :  { %v533_v44 = vpack.c.bf16 %v532_v43, %v532_v43 }
 0x441   :  { %1096 = vmatmul.mubr.bf16.vlgmr.msra.gmra.mrb[8].mxu1 %v533_v44 }
 0x442   :  { %1120 = vmatpush3.bf16.msra.mxu1 %v1374_v8  ;;  %1135 = vmatprep.mubr.msk.bf16.mxu1 %vm1287_vm1, %v1286_v1 }
 0x443   :  { %1121 = vmatprep.subr.bf16.mxu1 %v1286_v1 }
 0x446   :  { %1122 = vmatpush3.bf16.msra.mxu1 %v1393_v14 }
 0x447   :  { %1123 = vmatprep.subr.bf16.mxu1 %v1286_v1 }
 0x44a   :  { %1124 = vmatpush3.bf16.msra.mxu1 %v1401_v16 }
 0x44b   :  { %1125 = vmatprep.subr.bf16.mxu1 %v1286_v1 }
 0x44e   :  { %1126 = vmatpush3.bf16.msra.mxu1 %v1411_v21 }
 0x44f   :  { %1127 = vmatprep.subr.bf16.mxu1 %v1286_v1 }
 0x452   :  { %1128 = vmatpush3.bf16.msra.mxu1 %v1419_v24 }
 0x453   :  { %1129 = vmatprep.subr.bf16.mxu1 %v1286_v1 }
 0x456   :  { %1130 = vmatpush3.bf16.msra.mxu1 %v1429_v30 }
 0x457   :  { %1131 = vmatprep.subr.bf16.mxu1 %v1286_v1 }
 0x45a   :  { %1132 = vmatpush3.bf16.msra.mxu1 %v1437_v32 }
 0x45b   :  { %1133 = vmatprep.subr.bf16.mxu1 %v1286_v1 }
 0x45e   :  { %1134 = vmatpush3.bf16.msra.mxu1 %v1444_v34 }
 0x45f   :  { %1159 = vmatprep.subr.bf16.mxu1 %v1286_v1 }
 0x514   :  { %v568_v45 = vpop.f32.mrb[8].mxu1 }
 0x515   :  { %v574_v46 = vadd.f32 %v568_v45, %v1506_v63  ;;  %v1097_v47 = vpop.f32.mrb[9].mxu1 }
 0x516   :  { %v571_v48 = vpop.f32.mrb[10].mxu1 }
 0x517   :  { %1221 = vtanh.f32 %v574_v46  ;;  %v1098_v49 = vpop.f32.mrb[11].mxu1 }
 0x521   :  { %v1222_v51 = vpop.eup %1221 }
 0x522   :  { %v576_v52 = vsel %vm291_vm11, %v1222_v51, %v532_v43 }
 0x523   :  { %v577_v53 = vpack.c.bf16 %v576_v52, %v576_v52 }
 0x525   :  { %1116 = vmatmul.mubr.bf16.vlgmr.msra.gmra.mrb[16].mxu0 %v577_v53 }
 0x526   :  { %1140 = vmatpush3.bf16.msra.mxu0 %v1374_v8  ;;  %1155 = vmatprep.mubr.msk.bf16.mxu0 %vm1287_vm1, %v1286_v1 }
 0x527   :  { %1141 = vmatprep.subr.bf16.mxu0 %v1286_v1 }
 0x52a   :  { %1142 = vmatpush3.bf16.msra.mxu0 %v1393_v14 }
 0x52b   :  { %1143 = vmatprep.subr.bf16.mxu0 %v1286_v1 }
 0x52e   :  { %1144 = vmatpush3.bf16.msra.mxu0 %v1401_v16 }
 0x52f   :  { %1145 = vmatprep.subr.bf16.mxu0 %v1286_v1 }
 0x532   :  { %1146 = vmatpush3.bf16.msra.mxu0 %v1411_v21 }
 0x533   :  { %1147 = vmatprep.subr.bf16.mxu0 %v1286_v1 }
 0x536   :  { %1148 = vmatpush3.bf16.msra.mxu0 %v1419_v24  ;;  %v296_v24 = vpop.permute.xlu1 %295 }
 0x537   :  { %1149 = vmatprep.subr.bf16.mxu0 %v1286_v1  ;;  %vm297_vm12 = vcmp.eq.s32.totalorder %v296_v24, 1 }
 0x53a   :  { %1150 = vmatpush3.bf16.msra.mxu0 %v1429_v30  ;;  %v308_v18 = vpop.permute.xlu1 %307 }
 0x53b   :  { %1151 = vmatprep.subr.bf16.mxu0 %v1286_v1  ;;  %vm309_vm13 = vcmp.eq.s32.totalorder %v308_v18, 1 }
 0x53e   :  { %1152 = vmatpush3.bf16.msra.mxu0 %v1437_v32  ;;  %v1205_v32 = vld [vmem:[#allocation4] sm:$0xff]  }
 0x53f   :  { %1153 = vmatprep.subr.bf16.mxu0 %v1286_v1 }
 0x542   :  { %1154 = vmatpush3.bf16.msra.mxu0 %v1444_v34  ;;  %v1207_v34 = vld [vmem:[#allocation4 + $0x10] sm:$0xff]  }
 0x5f8   :  { %v612_v8 = vpop.f32.mrb[16].mxu0 }
 0x5f9   :  { %v618_v14 = vadd.f32 %v612_v8, %v1510_v5  ;;  %v1117_v16 = vpop.f32.mrb[17].mxu0 }
 0x5fa   :  { %v615_v21 = vpop.f32.mrb[18].mxu0 }
 0x5fb   :  { %1223 = vtanh.f32 %v618_v14  ;;  %v1118_v54 = vpop.f32.mrb[19].mxu0 }
 0x605   :  { %v1224_v55 = vpop.eup %1223 }
 0x606   :  { %v620_v56 = vsel %vm297_vm12, %v1224_v55, %v576_v52 }
 0x607   :  { %v621_v30 = vpack.c.bf16 %v620_v56, %v620_v56 }
 0x609   :  { %1136 = vmatmul.mubr.bf16.vlgmr.msra.gmra.mrb[12].mxu1 %v621_v30 }
 0x60a   :  { %1175 = vmatprep.mubr.msk.bf16.mxu1 %vm1287_vm1, %v1286_v1  ;;  %1160 = vmatpush3.bf16.msra.mxu1 %v1205_v32  ;;  %vm303_vm1 = vcmp.eq.s32.totalorder %v302_v3, 1 }
 0x60b   :  { %1161 = vmatprep.subr.bf16.mxu1 %v1286_v1 }
 0x60e   :  { %1162 = vmatpush3.bf16.msra.mxu1 %v1206_v57 }
 0x60f   :  { %1163 = vmatprep.subr.bf16.mxu1 %v1286_v1 }
 0x612   :  { %1164 = vmatpush3.bf16.msra.mxu1 %v1207_v34 }
 0x613   :  { %1165 = vmatprep.subr.bf16.mxu1 %v1286_v1 }
 0x616   :  { %1166 = vmatpush3.bf16.msra.mxu1 %v1208_v58 }
 0x617   :  { %1167 = vmatprep.subr.bf16.mxu1 %v1286_v1 }
 0x61a   :  { %1168 = vmatpush3.bf16.msra.mxu1 %v1209_v7 }
 0x61b   :  { %1169 = vmatprep.subr.bf16.mxu1 %v1286_v1 }
 0x61e   :  { %1170 = vmatpush3.bf16.msra.mxu1 %v1210_v9 }
 0x61f   :  { %1171 = vmatprep.subr.bf16.mxu1 %v1286_v1 }
 0x622   :  { %1172 = vmatpush3.bf16.msra.mxu1 %v1211_v10 }
 0x623   :  { %1173 = vmatprep.subr.bf16.mxu1 %v1286_v1 }
 0x6dc   :  { %v656_v59 = vpop.f32.mrb[12].mxu1 }
 0x6dd   :  { %v662_v60 = vadd.f32 %v656_v59, %v1504_v61  ;;  %v1137_v62 = vpop.f32.mrb[13].mxu1  ;;  %v1212_v61 = vld [vmem:[#allocation4 + $0x38] sm:$0xff]  }
 0x6de   :  { %v659_v63 = vpop.f32.mrb[14].mxu1  ;;  %1174 = vmatpush3.bf16.msra.mxu1 %v1212_v61 }
 0x6df   :  { %1225 = vtanh.f32 %v662_v60  ;;  %v1138_v0 = vpop.f32.mrb[15].mxu1 }
 0x6e9   :  { %v1226_v4 = vpop.eup %1225 }
 0x6ea   :  { %v664_v5 = vsel %vm303_vm1, %v1226_v4, %v620_v56 }
 0x6eb   :  { %v665_v6 = vpack.c.bf16 %v664_v5, %v664_v5 }
 0x6ed   :  { %1156 = vmatmul.mubr.bf16.vlgmr.msra.gmra.mrb[20].mxu0 %v665_v6 }
 0x7c0   :  { %v700_v11 = vpop.f32.mrb[20].mxu0 }
 0x7c1   :  { %v706_v12 = vadd.f32 %v700_v11, %v1508_v2  ;;  %v1157_v13 = vpop.f32.mrb[21].mxu0 }
 0x7c2   :  { %v703_v15 = vpop.f32.mrb[22].mxu0 }
 0x7c3   :  { %1227 = vtanh.f32 %v706_v12  ;;  %v1158_v17 = vpop.f32.mrb[23].mxu0 }
 0x7cd   :  { %v1228_v19 = vpop.eup %1227 }
 0x7ce   :  { %v708_v20 = vsel %vm309_vm13, %v1228_v19, %v664_v5 }
 0x7cf   :  { %v709_v22 = vpack.c.bf16 %v708_v20, %v708_v20 }
 0x7d1   :  { %1176 = vmatmul.mubr.bf16.vlgmr.msra.gmra.mrb[16].mxu1 %v709_v22 }
 0x8a4   :  { %v815_v25 = vpop.f32.mrb[16].mxu1 }
 0x8a5   :  { %v816_v1 = vadd.f32 %v873_v23, %v815_v25  ;;  %v1177_v26 = vpop.f32.mrb[17].mxu1 }
 0x8a6   :  { %v818_v27 = vpop.f32.mrb[18].mxu1 }
 0x8a7   :  { %v822_v28 = vand.u32 2147483647, %v816_v1  ;;  %v1178_v2 = vpop.f32.mrb[19].mxu1  ;;  %v821_v43 = vmax.f32 %v816_v1, 0.0 }
 0x8a9   :  { %v823_v29 = vsub.f32 0.0, %v822_v28 }
 0x8ab   :  { %v824_v31 = vmul.f32 1.442695, %v823_v29 }
 0x8ad   :  { %1229 = vpow2.f32 %v824_v31 }
 0x8b7   :  { %v1230_v33 = vpop.eup %1229 }
 0x8b8   :  { %v826_v35 = vadd.f32 1.0, %v1230_v33  ;;  %v829_v36 = vmul.f32 -0.5, %v1230_v33  ;;  %v832_v39 = vand.u32 2147483647, %v1230_v33 }
 0x8ba   :  { %1231 = vlog2.f32 %v826_v35  ;;  %v830_v37 = vadd.f32 1.0, %v829_v36  ;;  %vm833_vm14 = vcmp.lt.f32.partialorder %v832_v39, 0.0004427343 }
 0x8bc   :  { %v831_v42 = vmul.f32 %v1230_v33, %v830_v37 }
 0x8c4   :  { %v1232_v40 = vpop.eup %1231 }
 0x8c5   :  { %v828_v41 = vmul.f32 0.6931472, %v1232_v40 }
 0x8c7   :  { %v834_v44 = vsel %vm833_vm14, %v831_v42, %v828_v41 }
 0x8c8   :  { %v835_v45 = vadd.f32 %v834_v44, %v821_v43 }
 0x8ca   :  { %v837_v46 = vsel %vm836_vm15, %v816_v1, %v835_v45 }
 0x8cb   :  { %838 = vst [vmem:[%s1633_s7] sm:$0xff] %v837_v46 }
 0x8cc   :  { %843 = vsyncpa [#allocation3], 1 }
 0x8cd   :  { %844 = vsyncpa [#allocation5], 1 }

</bundles_post_ra>
